<compile_context>
chip_gen: v7x
topology: tpu7x:2x2x1
jax: 0.10.0
libtpu: 0.0.40
codegen_flags: <defaults>
</compile_context>

<pallas_src>
import functools
import math

import jax
import jax.numpy as jnp
from jax.experimental import pallas as pl
from jax.experimental.pallas import tpu as pltpu


def _round_up(v, m):
    return (v + m - 1) // m * m


def _sigmoid(x):
    # sigmoid(x) == 0.5 * tanh(0.5 * x) + 0.5  (one EUP push instead of exp+div)
    return 0.5 * jnp.tanh(0.5 * x) + 0.5


# ----------------------------------------------------------------------------
# Fused kernel: num_layers bi-LSTM cell steps + MLP head, one body.
#   x_ref : (block_b, fin_pad) f32
#   w_ref : (R, WCOL) bf16 weight slab; per-weight windows given by wmeta
#   b_ref : (8*n_bias, WCOL) f32 bias slab; per-bias rows given by bmeta
#   o_ref : (block_b, n_pad) bf16, lane-dense (sliced to n_out in the wrapper)
# wmeta[k] = (row_off, rows, cols); bmeta[k] = (row_off, cols)
# order: LSTM layer 0..L-1, fc1, fc2, fc3.  Gate columns inside each LSTM
# weight: [i_fwd|i_bwd|0.. | g_fwd|g_bwd|0.. | o_fwd|o_bwd|0..], groups gp wide.
# ----------------------------------------------------------------------------
def fused_forward_kernel(x_ref, w_ref, b_ref, out_ref, *, num_layers, gp,
                         wmeta, bmeta):
    h = x_ref[...]                                        # (block_b, fin_pad) f32
    for l in range(num_layers):
        wo, wr, wc = wmeta[l]
        bo, bc = bmeta[l]
        W = w_ref[wo:wo + wr, 0:wc]                       # static slice (free view)
        b = b_ref[bo:bo + 1, 0:bc]
        gates = jnp.dot(h.astype(W.dtype), W,
                        preferred_element_type=jnp.float32) + b
        i = _sigmoid(gates[:, 0:gp])                      # full 128-lane groups
        g = jnp.tanh(gates[:, gp:2 * gp])
        o = _sigmoid(gates[:, 2 * gp:3 * gp])
        h = o * jnp.tanh(i * g)                           # (block_b, gp); pad lanes stay 0

    # MLP head: relu(h@w1+t1), relu(.@w2+t2), .@w3+b3, sigmoid
    for k, relu in ((num_layers, True), (num_layers + 1, True),
                    (num_layers + 2, False)):
        wo, wr, wc = wmeta[k]
        bo, bc = bmeta[k]
        W = w_ref[wo:wo + wr, 0:wc]
        t = b_ref[bo:bo + 1, 0:bc]
        h = jnp.dot(h.astype(W.dtype), W,
                    preferred_element_type=jnp.float32) + t
        if relu:
            h = jnp.maximum(h, 0.0)
    out_ref[...] = _sigmoid(h).astype(out_ref.dtype)


def forward_pallas(x, fused, *, batch_block=None, out_dtype=jnp.bfloat16):
    B = x.shape[0]
    fin_pad = fused["fin_pad"]
    n_out = fused["n_out"]
    n_pad = fused["n_pad"]

    # Pad input features to the kernel's K (zeros; matching weight rows are 0).
    if x.shape[1] < fin_pad:
        x = jnp.pad(x, ((0, 0), (0, fin_pad - x.shape[1])))

    # Batch blocking: big blocks to amortize ~0.35us/step, >=2 steps once there
    # is enough work so the "parallel" axis can use both v7x TensorCores.
    if batch_block is None:
        cap = 2048                       # per-step intermediates stay < ~16 MiB
        n_steps = pl.cdiv(B, cap)
        if B >= 256:
            n_steps = max(n_steps, 2)
        if n_steps == 1:
            batch_block = B              # block == full dim: no (8,128) constraint
        else:
            batch_block = _round_up(pl.cdiv(B, n_steps), 16)

    # Ragged batches: pad with zero rows instead of asserting.
    B_pad = _round_up(B, batch_block)
    if B_pad != B:
        x = jnp.pad(x, ((0, B_pad - B), (0, 0)))
    grid = (B_pad // batch_block,)

    wslab = fused["wslab"]
    bslab = fused["bslab"]
    kernel = functools.partial(
        fused_forward_kernel,
        num_layers=fused["num_layers"], gp=fused["gp"],
        wmeta=fused["wmeta"], bmeta=fused["bmeta"])

    out = pl.pallas_call(
        kernel,
        out_shape=jax.ShapeDtypeStruct((B_pad, n_pad), out_dtype),
        grid=grid,
        in_specs=[
            pl.BlockSpec((batch_block, fin_pad), lambda i: (i, 0)),
            pl.BlockSpec(wslab.shape, lambda i: (0, 0)),   # resident weight slab
            pl.BlockSpec(bslab.shape, lambda i: (0, 0)),   # resident bias slab
        ],
        out_specs=pl.BlockSpec((batch_block, n_pad), lambda i: (i, 0)),
        compiler_params=pltpu.CompilerParams(
            dimension_semantics=("parallel",),
            vmem_limit_bytes=48 * 1024 * 1024),
    )(x, wslab, bslab)
    return out[:B, :n_out]


# ----------------------------------------------------------------------------
# Parameter construction: raw PyTorch-layout params (f32 reference) and the
# fused / folded / lane-padded / slab-packed kernel params.
# ----------------------------------------------------------------------------
def init_params(key, input_size, hidden_size, num_layers, n_out, eps=1e-5):
    H = hidden_size
    gp = _round_up(2 * H, 128)            # lane-aligned gate-group width
    fin_pad = _round_up(input_size, 16)   # bf16 sublane-tile aligned K for layer 0
    n_pad = _round_up(n_out, 128)         # lane-dense output width

    keys = iter(jax.random.split(key, 8 * num_layers + 32))
    u = lambda k, shape, s: jax.random.uniform(k, shape, jnp.float32, -s, s)
    k_lstm = 1.0 / math.sqrt(H)

    # ---- raw (PyTorch-layout) params ----
    raw_lstm = []
    for layer in range(num_layers):
        f_in = input_size if layer == 0 else 2 * H
        dirs = {}
        for d in ("f", "b"):
            w_ih = u(next(keys), (4 * H, f_in), k_lstm)   # PyTorch rows [i|f|g|o]
            b_ih = u(next(keys), (4 * H,), k_lstm)
            b_hh = u(next(keys), (4 * H,), k_lstm)
            # W_hh exists in the module but multiplies h0 == 0 (seq_len==1): omitted.
            dirs[d] = (w_ih, b_ih, b_hh)
        raw_lstm.append(dirs)

    def linear(k1, k2, fan_in, fan_out):
        s = 1.0 / math.sqrt(fan_in)
        return u(k1, (fan_out, fan_in), s), u(k2, (fan_out,), s)

    def bn_stats(kg, kb, km, kv, feat):
        gamma = 1.0 + 0.1 * jax.random.normal(kg, (feat,), jnp.float32)
        beta = 0.1 * jax.random.normal(kb, (feat,), jnp.float32)
        mean = 0.1 * jax.random.normal(km, (feat,), jnp.float32)
        var = jnp.abs(1.0 + 0.1 * jax.random.normal(kv, (feat,), jnp.float32))
        return gamma, beta, mean, var

    w1, b1 = linear(next(keys), next(keys), 2 * H, 512)
    bn1 = bn_stats(next(keys), next(keys), next(keys), next(keys), 512)
    w2, b2 = linear(next(keys), next(keys), 512, 256)
    bn2 = bn_stats(next(keys), next(keys), next(keys), next(keys), 256)
    w3, b3 = linear(next(keys), next(keys), 256, n_out)

    raw = dict(lstm=raw_lstm, fc1=(w1, b1), bn1=bn1,
               fc2=(w2, b2), bn2=bn2, fc3=(w3, b3))

    # ---- fused kernel weights (forget gate dropped, gates lane-padded) ----
    def lstm_fused(dirs, f_in, in_rows):
        W = jnp.zeros((in_rows, 3 * gp), jnp.float32)
        bias = jnp.zeros((3 * gp,), jnp.float32)
        for di, d in enumerate(("f", "b")):
            w_ih, b_ih, b_hh = dirs[d]
            wt = w_ih.T                                   # (f_in, 4H)
            bsum = b_ih + b_hh
            # PyTorch gate rows: i=[0,H) g=[2H,3H) o=[3H,4H); forget dropped.
            for gi, gs in enumerate((slice(0, H), slice(2 * H, 3 * H),
                                     slice(3 * H, 4 * H))):
                c0 = gi * gp + di * H
                W = W.at[0:f_in, c0:c0 + H].set(wt[:, gs])
                bias = bias.at[c0:c0 + H].set(bsum[gs])
        return W, bias

    weight_arrays, bias_arrays = [], []
    for layer in range(num_layers):
        f_in = input_size if layer == 0 else 2 * H
        in_rows = fin_pad if layer == 0 else gp
        W, bvec = lstm_fused(raw_lstm[layer], f_in, in_rows)
        weight_arrays.append(W)
        bias_arrays.append(bvec)

    def fold_bn(w, b, bnp, in_rows):
        gamma, beta, mean, var = bnp
        scale = gamma / jnp.sqrt(var + eps)
        wf = jnp.zeros((in_rows, w.shape[0]), jnp.float32)
        wf = wf.at[0:w.shape[1], :].set(w.T * scale[None, :])
        tf = (b - mean) * scale + beta
        return wf, tf

    w1f, t1f = fold_bn(w1, b1, bn1, gp)        # pad rows for h's zero pad lanes
    w2f, t2f = fold_bn(w2, b2, bn2, 512)
    w3f = jnp.zeros((256, n_pad), jnp.float32).at[:, :n_out].set(w3.T)
    b3f = jnp.zeros((n_pad,), jnp.float32).at[:n_out].set(b3)
    weight_arrays += [w1f, w2f, w3f]
    bias_arrays += [t1f, t2f, b3f]

    # ---- pack into one bf16 weight slab + one f32 bias slab ----
    wcol = _round_up(max(a.shape[1] for a in weight_arrays), 128)
    wmeta, row = [], 0
    for a in weight_arrays:
        wmeta.append((row, a.shape[0], a.shape[1]))
        row += _round_up(a.shape[0], 16)                  # bf16 (16,128) tile aligned
    wslab = jnp.zeros((_round_up(row, 16), wcol), jnp.float32)
    for (off, r, c), a in zip(wmeta, weight_arrays):
        wslab = wslab.at[off:off + r, 0:c].set(a)
    wslab = wslab.astype(jnp.bfloat16)

    bmeta = []
    bslab = jnp.zeros((8 * len(bias_arrays), wcol), jnp.float32)
    for k, bvec in enumerate(bias_arrays):
        bmeta.append((8 * k, bvec.shape[0]))              # f32 (8,128) tile aligned
        bslab = bslab.at[8 * k, 0:bvec.shape[0]].set(bvec)

    fused = dict(wslab=wslab, bslab=bslab,
                 wmeta=tuple(wmeta), bmeta=tuple(bmeta),
                 gp=gp, fin_pad=fin_pad, n_pad=n_pad, n_out=n_out,
                 num_layers=num_layers, hidden_size=H)
    return raw, fused


# ----------------------------------------------------------------------------
# References: (1) exact mirror of the kernel math (packed bf16 slabs);
#             (2) full f32 PyTorch-semantics reference (raw params).
# ----------------------------------------------------------------------------
def forward_ref_fused(x, fused):
    gp, L = fused["gp"], fused["num_layers"]
    w, b = fused["wslab"], fused["bslab"]
    h = x
    if h.shape[1] < fused["fin_pad"]:
        h = jnp.pad(h, ((0, 0), (0, fused["fin_pad"] - h.shape[1])))
    for l in range(L):
        wo, wr, wc = fused["wmeta"][l]
        bo, bc = fused["bmeta"][l]
        gates = jnp.dot(h.astype(w.dtype), w[wo:wo + wr, 0:wc],
                        preferred_element_type=jnp.float32) + b[bo:bo + 1, 0:bc]
        i = _sigmoid(gates[:, 0:gp])
        g = jnp.tanh(gates[:, gp:2 * gp])
        o = _sigmoid(gates[:, 2 * gp:3 * gp])
        h = o * jnp.tanh(i * g)
    for k, relu in ((L, True), (L + 1, True), (L + 2, False)):
        wo, wr, wc = fused["wmeta"][k]
        bo, bc = fused["bmeta"][k]
        h = jnp.dot(h.astype(w.dtype), w[wo:wo + wr, 0:wc],
                    preferred_element_type=jnp.float32) + b[bo:bo + 1, 0:bc]
        if relu:
            h = jnp.maximum(h, 0.0)
    return _sigmoid(h)[:, :fused["n_out"]]


def forward_ref_f32(x, raw, hidden_size, eps=1e-5):
    H = hidden_size
    h = x
    for layer in raw["lstm"]:
        outs = []
        for d in ("f", "b"):
            w_ih, b_ih, b_hh = layer[d]
            gates = h @ w_ih.T + b_ih + b_hh
            i = jax.nn.sigmoid(gates[:, 0:H])
            # forget gate multiplies c0 == 0 -> dropped
            g = jnp.tanh(gates[:, 2 * H:3 * H])
            o = jax.nn.sigmoid(gates[:, 3 * H:4 * H])
            outs.append(o * jnp.tanh(i * g))
        h = jnp.concatenate(outs, axis=1)

    def lin_bn_relu(z, fc, bnp):
        w, b = fc
        gamma, beta, mean, var = bnp
        z = z @ w.T + b
        z = (z - mean) / jnp.sqrt(var + eps) * gamma + beta
        return jnp.maximum(z, 0.0)

    z = lin_bn_relu(h, raw["fc1"], raw["bn1"])
    z = lin_bn_relu(z, raw["fc2"], raw["bn2"])
    w3, b3 = raw["fc3"]
    return jax.nn.sigmoid(z @ w3.T + b3)


if __name__ == "__main__":
    input_size, hidden_size, num_layers, n_out = 16, 32, 2, 4
    batch = 8

    key = jax.random.PRNGKey(0)
    k_x, k_p = jax.random.split(key)
    x = jax.random.normal(k_x, (batch, input_size), jnp.float32)
    raw, fused = init_params(k_p, input_size, hidden_size, num_layers, n_out)

    out = jax.block_until_ready(forward_pallas(x, fused))
    assert out.shape == (batch, n_out)
    out_f32 = out.astype(jnp.float32)

    ref_exact = forward_ref_fused(x, fused)            # same math as the kernel
    assert jnp.allclose(out_f32, ref_exact, rtol=5e-3, atol=5e-3), \
        "mismatch vs fused (bf16) reference"

    ref_f32 = forward_ref_f32(x, raw, hidden_size)     # full-precision semantics
    assert jnp.allclose(out_f32, ref_f32, rtol=3e-2, atol=3e-2), \
        "mismatch vs f32 reference"

    print("KERNEL_OK")
</pallas_src>

<mosaic_0001>
module attributes {stable_mosaic.version = 11 : i64} {
  func.func @fused_forward_kernel(%arg0: i32, %arg1: memref<8x16xf32, #tpu.memory_space<vmem>>, %arg2: memref<1040x512xbf16, #tpu.memory_space<vmem>>, %arg3: memref<40x512xf32, #tpu.memory_space<vmem>>, %arg4: memref<8x128xbf16, #tpu.memory_space<vmem>>) attributes {dimension_semantics = [#tpu.dimension_semantics<parallel>], iteration_bounds = array<i64: 1>, scalar_prefetch = 0 : i64, scratch_operands = 0 : i64, tpu.core_type = #tpu.core_type<tc>, window_params = [{transform_indices = @transform_0, window_bounds = array<i64: 8, 16>}, {pipeline_mode = #tpu.pipeline_mode<synchronous>, transform_indices = @transform_1, window_bounds = array<i64: 1040, 512>}, {pipeline_mode = #tpu.pipeline_mode<synchronous>, transform_indices = @transform_2, window_bounds = array<i64: 40, 512>}, {transform_indices = @transform_3, window_bounds = array<i64: 8, 128>}]} {
    %c0 = arith.constant 0 : index
    %c0_0 = arith.constant 0 : index
    %0 = vector.load %arg1[%c0, %c0_0] : memref<8x16xf32, #tpu.memory_space<vmem>>, vector<8x16xf32>
    %c0_1 = arith.constant 0 : index
    %c0_2 = arith.constant 0 : index
    %1 = vector.load %arg2[%c0_1, %c0_2] : memref<1040x512xbf16, #tpu.memory_space<vmem>>, vector<16x384xbf16>
    %c0_3 = arith.constant 0 : index
    %c0_4 = arith.constant 0 : index
    %2 = vector.load %arg3[%c0_3, %c0_4] : memref<40x512xf32, #tpu.memory_space<vmem>>, vector<1x384xf32>
    %3 = arith.truncf %0 : vector<8x16xf32> to vector<8x16xbf16>
    %cst = arith.constant dense<0.000000e+00> : vector<8x384xf32>
    %4 = tpu.matmul %3, %1, %cst {dimension_numbers = #tpu.dot_dimension_numbers<[1], [0], [0], [1], [0, 0, 1, 1], [], []>} : vector<8x16xbf16>, vector<16x384xbf16>, vector<8x384xf32> -> vector<8x384xf32>
    %5 = vector.broadcast %2 : vector<1x384xf32> to vector<8x384xf32>
    %6 = arith.addf %4, %5 : vector<8x384xf32>
    %7 = vector.extract_strided_slice %6 {offsets = [0, 0], sizes = [8, 128], strides = [1, 1]} : vector<8x384xf32> to vector<8x128xf32>
    %cst_5 = arith.constant 5.000000e-01 : f32
    %8 = vector.broadcast %cst_5 : f32 to vector<8x128xf32>
    %9 = arith.mulf %8, %7 : vector<8x128xf32>
    %10 = math.tanh %9 : vector<8x128xf32>
    %cst_6 = arith.constant 5.000000e-01 : f32
    %11 = vector.broadcast %cst_6 : f32 to vector<8x128xf32>
    %12 = arith.mulf %11, %10 : vector<8x128xf32>
    %cst_7 = arith.constant 5.000000e-01 : f32
    %13 = vector.broadcast %cst_7 : f32 to vector<8x128xf32>
    %14 = arith.addf %12, %13 : vector<8x128xf32>
    %15 = vector.extract_strided_slice %6 {offsets = [0, 128], sizes = [8, 128], strides = [1, 1]} : vector<8x384xf32> to vector<8x128xf32>
    %16 = math.tanh %15 : vector<8x128xf32>
    %17 = vector.extract_strided_slice %6 {offsets = [0, 256], sizes = [8, 128], strides = [1, 1]} : vector<8x384xf32> to vector<8x128xf32>
    %cst_8 = arith.constant 5.000000e-01 : f32
    %18 = vector.broadcast %cst_8 : f32 to vector<8x128xf32>
    %19 = arith.mulf %18, %17 : vector<8x128xf32>
    %20 = math.tanh %19 : vector<8x128xf32>
    %cst_9 = arith.constant 5.000000e-01 : f32
    %21 = vector.broadcast %cst_9 : f32 to vector<8x128xf32>
    %22 = arith.mulf %21, %20 : vector<8x128xf32>
    %cst_10 = arith.constant 5.000000e-01 : f32
    %23 = vector.broadcast %cst_10 : f32 to vector<8x128xf32>
    %24 = arith.addf %22, %23 : vector<8x128xf32>
    %25 = arith.mulf %14, %16 : vector<8x128xf32>
    %26 = math.tanh %25 : vector<8x128xf32>
    %27 = arith.mulf %24, %26 : vector<8x128xf32>
    %c16 = arith.constant 16 : index
    %c0_11 = arith.constant 0 : index
    %28 = vector.load %arg2[%c16, %c0_11] : memref<1040x512xbf16, #tpu.memory_space<vmem>>, vector<128x384xbf16>
    %c8 = arith.constant 8 : index
    %c0_12 = arith.constant 0 : index
    %29 = vector.load %arg3[%c8, %c0_12] : memref<40x512xf32, #tpu.memory_space<vmem>>, vector<1x384xf32>
    %30 = arith.truncf %27 : vector<8x128xf32> to vector<8x128xbf16>
    %cst_13 = arith.constant dense<0.000000e+00> : vector<8x384xf32>
    %31 = tpu.matmul %30, %28, %cst_13 {dimension_numbers = #tpu.dot_dimension_numbers<[1], [0], [0], [1], [0, 0, 1, 1], [], []>} : vector<8x128xbf16>, vector<128x384xbf16>, vector<8x384xf32> -> vector<8x384xf32>
    %32 = vector.broadcast %29 : vector<1x384xf32> to vector<8x384xf32>
    %33 = arith.addf %31, %32 : vector<8x384xf32>
    %34 = vector.extract_strided_slice %33 {offsets = [0, 0], sizes = [8, 128], strides = [1, 1]} : vector<8x384xf32> to vector<8x128xf32>
    %cst_14 = arith.constant 5.000000e-01 : f32
    %35 = vector.broadcast %cst_14 : f32 to vector<8x128xf32>
    %36 = arith.mulf %35, %34 : vector<8x128xf32>
    %37 = math.tanh %36 : vector<8x128xf32>
    %cst_15 = arith.constant 5.000000e-01 : f32
    %38 = vector.broadcast %cst_15 : f32 to vector<8x128xf32>
    %39 = arith.mulf %38, %37 : vector<8x128xf32>
    %cst_16 = arith.constant 5.000000e-01 : f32
    %40 = vector.broadcast %cst_16 : f32 to vector<8x128xf32>
    %41 = arith.addf %39, %40 : vector<8x128xf32>
    %42 = vector.extract_strided_slice %33 {offsets = [0, 128], sizes = [8, 128], strides = [1, 1]} : vector<8x384xf32> to vector<8x128xf32>
    %43 = math.tanh %42 : vector<8x128xf32>
    %44 = vector.extract_strided_slice %33 {offsets = [0, 256], sizes = [8, 128], strides = [1, 1]} : vector<8x384xf32> to vector<8x128xf32>
    %cst_17 = arith.constant 5.000000e-01 : f32
    %45 = vector.broadcast %cst_17 : f32 to vector<8x128xf32>
    %46 = arith.mulf %45, %44 : vector<8x128xf32>
    %47 = math.tanh %46 : vector<8x128xf32>
    %cst_18 = arith.constant 5.000000e-01 : f32
    %48 = vector.broadcast %cst_18 : f32 to vector<8x128xf32>
    %49 = arith.mulf %48, %47 : vector<8x128xf32>
    %cst_19 = arith.constant 5.000000e-01 : f32
    %50 = vector.broadcast %cst_19 : f32 to vector<8x128xf32>
    %51 = arith.addf %49, %50 : vector<8x128xf32>
    %52 = arith.mulf %41, %43 : vector<8x128xf32>
    %53 = math.tanh %52 : vector<8x128xf32>
    %54 = arith.mulf %51, %53 : vector<8x128xf32>
    %c144 = arith.constant 144 : index
    %c0_20 = arith.constant 0 : index
    %55 = vector.load %arg2[%c144, %c0_20] : memref<1040x512xbf16, #tpu.memory_space<vmem>>, vector<128x512xbf16>
    %c16_21 = arith.constant 16 : index
    %c0_22 = arith.constant 0 : index
    %56 = vector.load %arg3[%c16_21, %c0_22] : memref<40x512xf32, #tpu.memory_space<vmem>>, vector<1x512xf32>
    %57 = arith.truncf %54 : vector<8x128xf32> to vector<8x128xbf16>
    %cst_23 = arith.constant dense<0.000000e+00> : vector<8x512xf32>
    %58 = tpu.matmul %57, %55, %cst_23 {dimension_numbers = #tpu.dot_dimension_numbers<[1], [0], [0], [1], [0, 0, 1, 1], [], []>} : vector<8x128xbf16>, vector<128x512xbf16>, vector<8x512xf32> -> vector<8x512xf32>
    %59 = vector.broadcast %56 : vector<1x512xf32> to vector<8x512xf32>
    %60 = arith.addf %58, %59 : vector<8x512xf32>
    %cst_24 = arith.constant 0.000000e+00 : f32
    %61 = vector.broadcast %cst_24 : f32 to vector<8x512xf32>
    %62 = arith.maximumf %60, %61 : vector<8x512xf32>
    %c272 = arith.constant 272 : index
    %c0_25 = arith.constant 0 : index
    %63 = vector.load %arg2[%c272, %c0_25] : memref<1040x512xbf16, #tpu.memory_space<vmem>>, vector<512x256xbf16>
    %c24 = arith.constant 24 : index
    %c0_26 = arith.constant 0 : index
    %64 = vector.load %arg3[%c24, %c0_26] : memref<40x512xf32, #tpu.memory_space<vmem>>, vector<1x256xf32>
    %65 = arith.truncf %62 : vector<8x512xf32> to vector<8x512xbf16>
    %cst_27 = arith.constant dense<0.000000e+00> : vector<8x256xf32>
    %66 = tpu.matmul %65, %63, %cst_27 {dimension_numbers = #tpu.dot_dimension_numbers<[1], [0], [0], [1], [0, 0, 1, 1], [], []>} : vector<8x512xbf16>, vector<512x256xbf16>, vector<8x256xf32> -> vector<8x256xf32>
    %67 = vector.broadcast %64 : vector<1x256xf32> to vector<8x256xf32>
    %68 = arith.addf %66, %67 : vector<8x256xf32>
    %cst_28 = arith.constant 0.000000e+00 : f32
    %69 = vector.broadcast %cst_28 : f32 to vector<8x256xf32>
    %70 = arith.maximumf %68, %69 : vector<8x256xf32>
    %c784 = arith.constant 784 : index
    %c0_29 = arith.constant 0 : index
    %71 = vector.load %arg2[%c784, %c0_29] : memref<1040x512xbf16, #tpu.memory_space<vmem>>, vector<256x128xbf16>
    %c32 = arith.constant 32 : index
    %c0_30 = arith.constant 0 : index
    %72 = vector.load %arg3[%c32, %c0_30] : memref<40x512xf32, #tpu.memory_space<vmem>>, vector<1x128xf32>
    %73 = arith.truncf %70 : vector<8x256xf32> to vector<8x256xbf16>
    %cst_31 = arith.constant dense<0.000000e+00> : vector<8x128xf32>
    %74 = tpu.matmul %73, %71, %cst_31 {dimension_numbers = #tpu.dot_dimension_numbers<[1], [0], [0], [1], [0, 0, 1, 1], [], []>} : vector<8x256xbf16>, vector<256x128xbf16>, vector<8x128xf32> -> vector<8x128xf32>
    %75 = vector.broadcast %72 : vector<1x128xf32> to vector<8x128xf32>
    %76 = arith.addf %74, %75 : vector<8x128xf32>
    %cst_32 = arith.constant 5.000000e-01 : f32
    %77 = vector.broadcast %cst_32 : f32 to vector<8x128xf32>
    %78 = arith.mulf %77, %76 : vector<8x128xf32>
    %79 = math.tanh %78 : vector<8x128xf32>
    %cst_33 = arith.constant 5.000000e-01 : f32
    %80 = vector.broadcast %cst_33 : f32 to vector<8x128xf32>
    %81 = arith.mulf %80, %79 : vector<8x128xf32>
    %cst_34 = arith.constant 5.000000e-01 : f32
    %82 = vector.broadcast %cst_34 : f32 to vector<8x128xf32>
    %83 = arith.addf %81, %82 : vector<8x128xf32>
    %84 = arith.truncf %83 : vector<8x128xf32> to vector<8x128xbf16>
    %c0_35 = arith.constant 0 : index
    %c0_36 = arith.constant 0 : index
    %85 = vector.load %arg4[%c0_35, %c0_36] : memref<8x128xbf16, #tpu.memory_space<vmem>>, vector<8x128xbf16>
    tpu.vector_store %arg4[%c0_35, %c0_36], %84 {strides = array<i32>} : memref<8x128xbf16, #tpu.memory_space<vmem>>, vector<8x128xbf16>,
    return
  }
  func.func @transform_0(%arg0: i32) -> (i32, i32) {
    %c0_i32 = arith.constant 0 : i32
    %c0_i32_0 = arith.constant 0 : i32
    return %arg0, %c0_i32 : i32, i32
  }
  func.func @transform_1(%arg0: i32) -> (i32, i32) {
    %c0_i32 = arith.constant 0 : i32
    %c0_i32_0 = arith.constant 0 : i32
    %c0_i32_1 = arith.constant 0 : i32
    return %c0_i32, %c0_i32_0 : i32, i32
  }
  func.func @transform_2(%arg0: i32) -> (i32, i32) {
    %c0_i32 = arith.constant 0 : i32
    %c0_i32_0 = arith.constant 0 : i32
    %c0_i32_1 = arith.constant 0 : i32
    return %c0_i32, %c0_i32_0 : i32, i32
  }
  func.func @transform_3(%arg0: i32) -> (i32, i32) {
    %c0_i32 = arith.constant 0 : i32
    %c0_i32_0 = arith.constant 0 : i32
    return %arg0, %c0_i32 : i32, i32
  }
}

</mosaic_0001>

<bundles_post_ra>
// kernel: tpu_custom_call.1
= control target key start
LH: loop header
LB: loop body
LE: loop exit
PB: predicated region body
PF: predicated region fallthrough
CT: control target
= control target key end

     0   :  { %8 = vsyncpa [#allocation3], 0  ;;  %s2096_s0 = inlined_call_operand.hbm [shape: f32[8,16], index: 0, kind: input, shape index: {}]   ;;  %s2097_s1 = inlined_call_operand.hbm [shape: bf16[1040,512], index: 1, kind: input, shape index: {}]   ;;  %s2098_s2 = inlined_call_operand.hbm [shape: f32[40,512], index: 2, kind: input, shape index: {}]   ;;  %s2099_s3 = inlined_call_operand.hbm [shape: bf16[8,128], index: 3, kind: output, shape index: {}]  }
   0x1   :  { %9 = vsyncpa [#allocation6], 0 }
   0x2   :  { %10 = vsyncpa [#allocation4], 0  ;;  %s1968_s12 = smov [#allocation5]   ;;  %s1874_s16 = scalar_lea.hbm %s2097_s1, 33280 }
   0x3   :  { %s26_s13 = sshll.u32 %s1968_s12, 4  ;;  %p1875_p0 = scmp.ne.s32.totalorder %s2097_s1, %s1874_s16  ;;  %s27_s13 = int_to_ptr.vmem [resolvable:$true] %s26_s13 }
   0x4   :  { %p1878_p1 = scmp.lt.u32.totalorder %s1874_s16, %s2097_s1 }
   0x6   :  { %p1880_p2 = pnand %p1878_p1, %p1875_p0 }
   0x8   :  { %1883 = shalt.err (!%p1880_p2)
}
   0x9   :  { %s1884_s21 = scalar_lea.vmem %s27_s13, 33280  ;;  %p1889_p4 = scmp.lt.s32.totalorder %s27_s13, %s27_s13 }
   0xa   :  { %p1885_p3 = scmp.ne.s32.totalorder %s27_s13, %s1884_s21  ;;  %p1890_p5 = scmp.lt.s32.totalorder %s1884_s21, %s1884_s21 }
   0xc   :  { %p1891_p6 = por %p1890_p5, %p1889_p4 }
   0xe   :  { %p1892_p7 = pnand %p1891_p6, %p1885_p3 }
  0x10   :  { %1895 = shalt.err (!%p1892_p7)
}
  0x11   :  { %s1969_s22 = smov 256   ;;  %s1970_s23 = smov 16  }
  0x12   :  { %32 = dma.hbm_to_vmem [thread:$0]  %s2097_s1, 33280, %s27_s13, [#allocation6], %s1969_s22, %s1969_s22, %s1970_s23  }
  0x13   :  { %s1971_s26 = smov [#allocation2]   ;;  %s1972_s28 = smov [#allocation7]  }
  0x14   :  { %s17_s27 = sshll.u32 %s1971_s26, 4  ;;  %s38_s29 = sshll.u32 %s1972_s28, 4  ;;  %s18_s27 = int_to_ptr.vmem [resolvable:$true] %s17_s27  ;;  %s39_s29 = int_to_ptr.vmem [resolvable:$true] %s38_s29 }
  0x15   :  { %s1896_s5 = scalar_lea.hbm %s2096_s0, 128 }
  0x16   :  { %p1897_p8 = scmp.ne.s32.totalorder %s2096_s0, %s1896_s5  ;;  %p1900_p9 = scmp.lt.u32.totalorder %s1896_s5, %s2096_s0 }
  0x18   :  { %p1902_p10 = pnand %p1900_p9, %p1897_p8 }
  0x1a   :  { %1905 = shalt.err (!%p1902_p10)
}
  0x1b   :  { %s1906_s1 = scalar_lea.vmem %s18_s27, 128  ;;  %p1911_p12 = scmp.lt.s32.totalorder %s18_s27, %s18_s27 }
  0x1c   :  { %p1907_p11 = scmp.ne.s32.totalorder %s18_s27, %s1906_s1  ;;  %p1912_p13 = scmp.lt.s32.totalorder %s1906_s1, %s1906_s1 }
  0x1e   :  { %p1913_p0 = por %p1912_p13, %p1911_p12 }
  0x20   :  { %p1914_p1 = pnand %p1913_p0, %p1907_p11 }
  0x22   :  { %1917 = shalt.err (!%p1914_p1)
}
  0x23   :  { %20 = dma.hbm_to_vmem [thread:$0]  %s2096_s0, 128, %s18_s27, [#allocation3]  }
  0x24   :  { %s1918_s14 = scalar_lea.hbm %s2098_s2, 2560 }
  0x25   :  { %p1919_p2 = scmp.ne.s32.totalorder %s2098_s2, %s1918_s14  ;;  %p1922_p3 = scmp.lt.u32.totalorder %s1918_s14, %s2098_s2 }
  0x27   :  { %p1924_p4 = pnand %p1922_p3, %p1919_p2 }
  0x29   :  { %1927 = shalt.err (!%p1924_p4)
}
  0x2a   :  { %s1928_s19 = scalar_lea.vmem %s39_s29, 2560  ;;  %p1933_p6 = scmp.lt.s32.totalorder %s39_s29, %s39_s29 }
  0x2b   :  { %p1929_p5 = scmp.ne.s32.totalorder %s39_s29, %s1928_s19  ;;  %p1934_p7 = scmp.lt.s32.totalorder %s1928_s19, %s1928_s19 }
  0x2d   :  { %p1935_p8 = por %p1934_p7, %p1933_p6 }
  0x2f   :  { %p1936_p9 = pnand %p1935_p8, %p1929_p5 }
  0x31   :  { %1939 = shalt.err (!%p1936_p9)
}
  0x32   :  { %s1973_s0 = smov 512   ;;  %s1974_s20 = smov 32  }
  0x33   :  { %44 = dma.hbm_to_vmem [thread:$0]  %s2098_s2, 2560, %s39_s29, [#allocation6], %s1973_s0, %s1973_s0, %s1974_s20  }
  0x34   :  { %1962 = dma.done.wait [#allocation3], 128  }
  0x35   :  { %1963 = vsyncadd [#allocation3], 4294967168 }
  0x36   :  { %1964 = dma.done.wait [#allocation6], 35840  }
  0x37   :  { %1965 = vsyncadd [#allocation6], 4294931456  ;;  %v1975_v0 = vmov 0   ;;  %v1660_v1 = vld [vmem:[#allocation5 + $0x4] ss:$16 sps:$4 sm:$0xff]   ;;  %v55_v3 = vld [vmem:[#allocation2] sm:$0xff]  ;;  %v63_v23 = vlaneseq }
  0x38   :  { %130 = vmatprep.mubr.bf16.mxu1 %v1975_v0  ;;  %711 = vmatprep.mubr.bf16.mxu0 %v1975_v0  ;;  %v1662_v2 = vld [vmem:[#allocation5] ss:$16 sps:$4 sm:$0xff]   ;;  %v61_v4 = vpack.c.bf16 %v55_v3, %v55_v3  ;;  %vm94_vm0 = vcmask 130048   ;;  %v1663_v5 = vld [vmem:[#allocation5 + $0x8] ss:$16 sps:$4 sm:$0xff]   ;;  %v1976_v6 = vmov 0.0  }
  0x39   :  { %98 = vmatprep.subr.bf16.mxu1 %v1660_v1  ;;  %vm1977_vm1 = vmmov 0   ;;  %v1666_v7 = vld [vmem:[#allocation5 + $0x24] ss:$16 sps:$4 sm:$0xff]   ;;  %v1664_v8 = vld [vmem:[#allocation5 + $0x20] ss:$16 sps:$4 sm:$0xff]   ;;  %v2042_v24 = vshrl.u32 %v63_v23, 7 }
  0x3a   :  { %99 = vmatpush1.bf16.msra.mxu1 %v1662_v2  ;;  %v1669_v9 = vld [vmem:[#allocation5 + $0x44] ss:$16 sps:$4 sm:$0xff]   ;;  %v1667_v10 = vld [vmem:[#allocation5 + $0x40] ss:$16 sps:$4 sm:$0xff]   ;;  %v1688_v55 = vld [vmem:[#allocation5 + $0x28] ss:$16 sps:$4 sm:$0xff]  }
  0x3b   :  { %1617 = vmatprep.subr.bf16.mxu1 %v1976_v6  ;;  %v1672_v11 = vld [vmem:[#allocation5 + $0x64] ss:$16 sps:$4 sm:$0xff]   ;;  %v1670_v12 = vld [vmem:[#allocation5 + $0x60] ss:$16 sps:$4 sm:$0xff]   ;;  %v2045_v25 = vsub.s32 0, %v2042_v24  ;;  %v2049_v28 = vsub.s32 1, %v2042_v24 }
  0x3c   :  { %v1675_v13 = vld [vmem:[#allocation5 + $0x84] ss:$16 sps:$4 sm:$0xff]   ;;  %v1673_v14 = vld [vmem:[#allocation5 + $0x80] ss:$16 sps:$4 sm:$0xff]   ;;  %v2053_v33 = vsub.s32 2, %v2042_v24  ;;  %s1978_s2 = smov [#allocation8]  }
  0x3d   :  { %1446 = vmatmul.mubr.msk.bf16.vlgmr.msra.gmra.mrb[0].mxu1 %vm94_vm0, %v61_v4  ;;  %v1678_v15 = vld [vmem:[#allocation5 + $0xa4] ss:$16 sps:$4 sm:$0xff]   ;;  %v1676_v16 = vld [vmem:[#allocation5 + $0xa0] ss:$16 sps:$4 sm:$0xff]   ;;  %v1689_v57 = vld [vmem:[#allocation5 + $0x48] ss:$16 sps:$4 sm:$0xff]  }
  0x3e   :  { %1618 = vmatpush3.bf16.msra.mxu1 %v1663_v5  ;;  %1619 = vmatprep.mubr.msk.bf16.mxu1 %vm1977_vm1, %v1976_v6  ;;  %v1681_v17 = vld [vmem:[#allocation5 + $0xc4] ss:$16 sps:$4 sm:$0xff]   ;;  %v1679_v18 = vld [vmem:[#allocation5 + $0xc0] ss:$16 sps:$4 sm:$0xff]   ;;  %v1690_v58 = vld [vmem:[#allocation5 + $0x68] ss:$16 sps:$4 sm:$0xff]  }
  0x3f   :  { %370 = vmatprep.subr.bf16.mxu1 %v1666_v7  ;;  %v1684_v19 = vld [vmem:[#allocation5 + $0xe4] ss:$16 sps:$4 sm:$0xff]   ;;  %v1682_v20 = vld [vmem:[#allocation5 + $0xe0] ss:$16 sps:$4 sm:$0xff]   ;;  %v1691_v59 = vld [vmem:[#allocation5 + $0x88] ss:$16 sps:$4 sm:$0xff]  }
  0x40   :  { %v1687_v21 = vld [vmem:[#allocation5 + $0x104] ss:$16 sps:$4 sm:$0xff]   ;;  %v1685_v22 = vld [vmem:[#allocation5 + $0x100] ss:$16 sps:$4 sm:$0xff]   ;;  %v1692_v60 = vld [vmem:[#allocation5 + $0xa8] ss:$16 sps:$4 sm:$0xff]  }
  0x41   :  { %v60_v26 = vld [vmem:[#allocation7] ss:$8 sm:$0x7]  ;;  %v1696_v1 = vld [vmem:[#allocation5 + $0x124] ss:$16 sps:$4 sm:$0xff]   ;;  %s1433_s23 = sshll.u32 %s1978_s2, 4  ;;  %s1434_s23 = int_to_ptr.vmem [resolvable:$true] %s1433_s23 }
  0x42   :  { %v66_v27 = vrot.slane %v60_v26, %v2045_v25  ;;  %v70_v31 = vrot.slane %v60_v26, %v2049_v28  ;;  %v74_v38 = vrot.slane %v60_v26, %v2053_v33  ;;  %v1693_v61 = vld [vmem:[#allocation5 + $0xc8] ss:$16 sps:$4 sm:$0xff]   ;;  %v1700_v3 = vld [vmem:[#allocation5 + $0x12c] ss:$16 sps:$4 sm:$0xff]   ;;  %v1702_v5 = vld [vmem:[#allocation5 + $0x144] ss:$16 sps:$4 sm:$0xff]   ;;  %679 = vmatprep.subr.bf16.mxu0 %v1696_v1  ;;  %p1945_p11 = scmp.lt.s32.totalorder %s1434_s23, %s1434_s23 }
  0x43   :  { %v1694_v62 = vld [vmem:[#allocation5 + $0xe8] ss:$16 sps:$4 sm:$0xff]   ;;  %v1706_v7 = vld [vmem:[#allocation5 + $0x14c] ss:$16 sps:$4 sm:$0xff]   ;;  %v1731_v23 = vld [vmem:[#allocation5 + $0x1c0] ss:$16 sps:$4 sm:$0xff]  }
  0x44   :  { %v1695_v63 = vld [vmem:[#allocation5 + $0x108] ss:$16 sps:$4 sm:$0xff]   ;;  %v1732_v26 = vld [vmem:[#allocation5 + $0x1e4] ss:$16 sps:$4 sm:$0xff]   ;;  %v1744_v1 = vld [vmem:[#allocation5 + $0x220] ss:$16 sps:$4 sm:$0xff]  }
  0x45   :  { %1620 = vmatmul.mubr.msk.bf16.vlgmr.msra.gmra.mrb[4].mxu1 %vm94_vm0, %v61_v4  ;;  %v1698_v2 = vld [vmem:[#allocation5 + $0x128] ss:$16 sps:$4 sm:$0xff]   ;;  %v1701_v4 = vld [vmem:[#allocation5 + $0x120] ss:$16 sps:$4 sm:$0xff]   ;;  %s1940_s24 = scalar_lea.vmem %s1434_s23, 64 }
  0x46   :  { %402 = vmatprep.mubr.bf16.mxu1 %v1975_v0  ;;  %371 = vmatpush1.bf16.msra.mxu1 %v1664_v8  ;;  %v1704_v8 = vld [vmem:[#allocation5 + $0x148] ss:$16 sps:$4 sm:$0xff]   ;;  %p1941_p10 = scmp.ne.s32.totalorder %s1434_s23, %s1940_s24  ;;  %p1946_p12 = scmp.lt.s32.totalorder %s1940_s24, %s1940_s24 }
  0x47   :  { %372 = vmatprep.subr.bf16.mxu1 %v1669_v9  ;;  %680 = vmatpush1.bf16.msra.mxu0 %v1701_v4  ;;  %v1707_v9 = vld [vmem:[#allocation5 + $0x140] ss:$16 sps:$4 sm:$0xff]  }
  0x48   :  { %681 = vmatprep.subr.bf16.mxu0 %v1702_v5  ;;  %v1747_v4 = vld [vmem:[#allocation5 + $0x240] ss:$16 sps:$4 sm:$0xff]   ;;  %v1752_v5 = vld [vmem:[#allocation5 + $0x264] ss:$16 sps:$4 sm:$0xff]   ;;  %p1947_p13 = por %p1946_p12, %p1945_p11 }
  0x4a   :  { %373 = vmatpush1.bf16.msra.mxu1 %v1667_v10  ;;  %v1712_v10 = vld [vmem:[#allocation5 + $0x16c] ss:$16 sps:$4 sm:$0xff]   ;;  %p1948_p0 = pnand %p1947_p13, %p1941_p10 }
  0x4b   :  { %374 = vmatprep.subr.bf16.mxu1 %v1672_v11  ;;  %682 = vmatpush1.bf16.msra.mxu0 %v1707_v9  ;;  %v1710_v11 = vld [vmem:[#allocation5 + $0x168] ss:$16 sps:$4 sm:$0xff]   ;;  %v1753_v9 = vld [vmem:[#allocation5 + $0x280] ss:$16 sps:$4 sm:$0xff]  }
  0x4e   :  { %375 = vmatpush1.bf16.msra.mxu1 %v1670_v12  ;;  %v1714_v12 = vld [vmem:[#allocation5 + $0x184] ss:$16 sps:$4 sm:$0xff]  }
  0x4f   :  { %376 = vmatprep.subr.bf16.mxu1 %v1675_v13  ;;  %v1718_v13 = vld [vmem:[#allocation5 + $0x18c] ss:$16 sps:$4 sm:$0xff]  }
  0x52   :  { %377 = vmatpush1.bf16.msra.mxu1 %v1673_v14  ;;  %v1716_v14 = vld [vmem:[#allocation5 + $0x188] ss:$16 sps:$4 sm:$0xff]  }
  0x53   :  { %378 = vmatprep.subr.bf16.mxu1 %v1678_v15  ;;  %v1719_v15 = vld [vmem:[#allocation5 + $0x180] ss:$16 sps:$4 sm:$0xff]  }
  0x56   :  { %379 = vmatpush1.bf16.msra.mxu1 %v1676_v16  ;;  %v1720_v16 = vld [vmem:[#allocation5 + $0x1a4] ss:$16 sps:$4 sm:$0xff]  }
  0x57   :  { %380 = vmatprep.subr.bf16.mxu1 %v1681_v17  ;;  %v1724_v17 = vld [vmem:[#allocation5 + $0x1ac] ss:$16 sps:$4 sm:$0xff]  }
  0x5a   :  { %381 = vmatpush1.bf16.msra.mxu1 %v1679_v18  ;;  %v1722_v18 = vld [vmem:[#allocation5 + $0x1a8] ss:$16 sps:$4 sm:$0xff]  }
  0x5b   :  { %382 = vmatprep.subr.bf16.mxu1 %v1684_v19  ;;  %v1725_v19 = vld [vmem:[#allocation5 + $0x1a0] ss:$16 sps:$4 sm:$0xff]  }
  0x5e   :  { %383 = vmatpush1.bf16.msra.mxu1 %v1682_v20  ;;  %v1726_v20 = vld [vmem:[#allocation5 + $0x1c4] ss:$16 sps:$4 sm:$0xff]  }
  0x5f   :  { %384 = vmatprep.subr.bf16.mxu1 %v1687_v21  ;;  %v1730_v21 = vld [vmem:[#allocation5 + $0x1cc] ss:$16 sps:$4 sm:$0xff]  }
  0x62   :  { %385 = vmatpush1.bf16.msra.mxu1 %v1685_v22  ;;  %v1728_v22 = vld [vmem:[#allocation5 + $0x1c8] ss:$16 sps:$4 sm:$0xff]  }
  0x63   :  { %1623 = vmatprep.subr.bf16.mxu1 %v1976_v6 }
 0x110   :  { %v132_v29 = vpop.f32.mrb[0].mxu1 }
 0x111   :  { %v133_v30 = vadd.f32 %v132_v29, %v66_v27  ;;  %v134_v32 = vpop.f32.mrb[1].mxu1  ;;  %v1736_v27 = vld [vmem:[#allocation5 + $0x1ec] ss:$16 sps:$4 sm:$0xff]   ;;  %v1734_v29 = vld [vmem:[#allocation5 + $0x1e8] ss:$16 sps:$4 sm:$0xff]  }
 0x112   :  { %v136_v34 = vpop.f32.mrb[2].mxu1  ;;  %v135_v37 = vadd.f32 %v134_v32, %v70_v31  ;;  %v1738_v31 = vld [vmem:[#allocation5 + $0x204] ss:$16 sps:$4 sm:$0xff]   ;;  %v1740_v32 = vld [vmem:[#allocation5 + $0x208] ss:$16 sps:$4 sm:$0xff]  }
 0x113   :  { %v179_v35 = vmul.f32 0.5, %v133_v30  ;;  %v137_v36 = vpop.f32.mrb[3].mxu1  ;;  %v1737_v30 = vld [vmem:[#allocation5 + $0x1e0] ss:$16 sps:$4 sm:$0xff]   ;;  %v1742_v34 = vld [vmem:[#allocation5 + $0x20c] ss:$16 sps:$4 sm:$0xff]  }
 0x114   :  { %v1746_v36 = vld [vmem:[#allocation5 + $0x224] ss:$16 sps:$4 sm:$0xff]  }
 0x115   :  { %1856 = vtanh.f32 %v179_v35  ;;  %v1743_v35 = vld [vmem:[#allocation5 + $0x200] ss:$16 sps:$4 sm:$0xff]  }
 0x116   :  { %1858 = vtanh.f32 %v135_v37  ;;  %v224_v37 = vld [vmem:[#allocation7 + $0x20] ss:$8 sm:$0x7] }
 0x118   :  { %v173_v39 = vpop.f32.mrb[4].mxu1 }
 0x119   :  { %v174_v40 = vadd.f32 %v173_v39, %v74_v38  ;;  %v1621_v41 = vpop.f32.mrb[5].mxu1  ;;  %v230_v38 = vrot.slane %v224_v37, %v2045_v25 }
 0x11a   :  { %v176_v42 = vpop.f32.mrb[6].mxu1  ;;  %v234_v41 = vrot.slane %v224_v37, %v2049_v28 }
 0x11b   :  { %v184_v43 = vmul.f32 0.5, %v174_v40  ;;  %v1622_v44 = vpop.f32.mrb[7].mxu1 }
 0x11d   :  { %1860 = vtanh.f32 %v184_v43 }
 0x11f   :  { %v1857_v45 = vpop.eup %1856 }
 0x120   :  { %v181_v46 = vmul.f32 0.5, %v1857_v45  ;;  %v1859_v48 = vpop.eup %1858 }
 0x122   :  { %v182_v47 = vadd.f32 0.5, %v181_v46 }
 0x124   :  { %v188_v49 = vmul.f32 %v1859_v48, %v182_v47 }
 0x126   :  { %1862 = vtanh.f32 %v188_v49 }
 0x127   :  { %v1861_v50 = vpop.eup %1860 }
 0x128   :  { %v186_v51 = vmul.f32 0.5, %v1861_v50 }
 0x12a   :  { %v187_v52 = vadd.f32 0.5, %v186_v51 }
 0x130   :  { %v1863_v53 = vpop.eup %1862 }
 0x131   :  { %v190_v54 = vmul.f32 %v1863_v53, %v187_v52  ;;  %v238_v52 = vrot.slane %v224_v37, %v2053_v33  ;;  %v1840_v37 = vld [vmem:[#allocation5 + $0x720] ss:$16 sps:$4 sm:$0xff]  }
 0x133   :  { %v225_v56 = vpack.c.bf16 %v190_v54, %v190_v54 }
 0x135   :  { %403 = vmatmul.mubr.bf16.vlgmr.msra.gmra.mrb[8].mxu1 %v225_v56 }
 0x136   :  { %1624 = vmatpush3.bf16.msra.mxu1 %v1688_v55  ;;  %1639 = vmatprep.mubr.msk.bf16.mxu1 %vm1977_vm1, %v1976_v6 }
 0x137   :  { %1625 = vmatprep.subr.bf16.mxu1 %v1976_v6 }
 0x13a   :  { %1626 = vmatpush3.bf16.msra.mxu1 %v1689_v57 }
 0x13b   :  { %1627 = vmatprep.subr.bf16.mxu1 %v1976_v6 }
 0x13e   :  { %1628 = vmatpush3.bf16.msra.mxu1 %v1690_v58 }
 0x13f   :  { %1629 = vmatprep.subr.bf16.mxu1 %v1976_v6 }
 0x142   :  { %1630 = vmatpush3.bf16.msra.mxu1 %v1691_v59 }
 0x143   :  { %1631 = vmatprep.subr.bf16.mxu1 %v1976_v6 }
 0x146   :  { %1632 = vmatpush3.bf16.msra.mxu1 %v1692_v60 }
 0x147   :  { %1633 = vmatprep.subr.bf16.mxu1 %v1976_v6 }
 0x14a   :  { %1634 = vmatpush3.bf16.msra.mxu1 %v1693_v61 }
 0x14b   :  { %1635 = vmatprep.subr.bf16.mxu1 %v1976_v6 }
 0x14e   :  { %1636 = vmatpush3.bf16.msra.mxu1 %v1694_v62 }
 0x14f   :  { %1637 = vmatprep.subr.bf16.mxu1 %v1976_v6  ;;  %v1708_v6 = vld [vmem:[#allocation5 + $0x164] ss:$16 sps:$4 sm:$0xff]  }
 0x150   :  { %683 = vmatprep.subr.bf16.mxu0 %v1708_v6  ;;  %v1758_v6 = vld [vmem:[#allocation5 + $0x2a4] ss:$16 sps:$4 sm:$0xff]  }
 0x152   :  { %1638 = vmatpush3.bf16.msra.mxu1 %v1695_v63 }
 0x153   :  { %720 = vmatprep.subr.bf16.mxu1 %v1700_v3  ;;  %v1749_v3 = vld [vmem:[#allocation5 + $0x244] ss:$16 sps:$4 sm:$0xff]  }
 0x155   :  { %1640 = vmatmul.mubr.bf16.vlgmr.msra.gmra.mrb[12].mxu1 %v225_v56 }
 0x156   :  { %752 = vmatprep.mubr.bf16.mxu1 %v1975_v0  ;;  %721 = vmatpush1.bf16.msra.mxu1 %v1698_v2  ;;  %v1713_v0 = vld [vmem:[#allocation5 + $0x160] ss:$16 sps:$4 sm:$0xff]  }
 0x157   :  { %722 = vmatprep.subr.bf16.mxu1 %v1706_v7  ;;  %684 = vmatpush1.bf16.msra.mxu0 %v1713_v0  ;;  %v1750_v7 = vld [vmem:[#allocation5 + $0x260] ss:$16 sps:$4 sm:$0xff]  }
 0x158   :  { %685 = vmatprep.subr.bf16.mxu0 %v1714_v12  ;;  %v1759_v0 = vld [vmem:[#allocation5 + $0x2c0] ss:$16 sps:$4 sm:$0xff]   ;;  %v1764_v12 = vld [vmem:[#allocation5 + $0x2e4] ss:$16 sps:$4 sm:$0xff]  }
 0x15a   :  { %723 = vmatpush1.bf16.msra.mxu1 %v1704_v8  ;;  %v1755_v8 = vld [vmem:[#allocation5 + $0x284] ss:$16 sps:$4 sm:$0xff]  }
 0x15b   :  { %724 = vmatprep.subr.bf16.mxu1 %v1712_v10  ;;  %686 = vmatpush1.bf16.msra.mxu0 %v1719_v15  ;;  %v1756_v10 = vld [vmem:[#allocation5 + $0x2a0] ss:$16 sps:$4 sm:$0xff]  }
 0x15c   :  { %687 = vmatprep.subr.bf16.mxu0 %v1720_v16  ;;  %v1765_v15 = vld [vmem:[#allocation5 + $0x300] ss:$16 sps:$4 sm:$0xff]   ;;  %v1770_v16 = vld [vmem:[#allocation5 + $0x324] ss:$16 sps:$4 sm:$0xff]  }
 0x15e   :  { %725 = vmatpush1.bf16.msra.mxu1 %v1710_v11  ;;  %v1761_v11 = vld [vmem:[#allocation5 + $0x2c4] ss:$16 sps:$4 sm:$0xff]  }
 0x15f   :  { %726 = vmatprep.subr.bf16.mxu1 %v1718_v13  ;;  %688 = vmatpush1.bf16.msra.mxu0 %v1725_v19  ;;  %v1762_v13 = vld [vmem:[#allocation5 + $0x2e0] ss:$16 sps:$4 sm:$0xff]  }
 0x160   :  { %689 = vmatprep.subr.bf16.mxu0 %v1726_v20  ;;  %v1771_v19 = vld [vmem:[#allocation5 + $0x340] ss:$16 sps:$4 sm:$0xff]   ;;  %v1776_v20 = vld [vmem:[#allocation5 + $0x364] ss:$16 sps:$4 sm:$0xff]  }
 0x162   :  { %727 = vmatpush1.bf16.msra.mxu1 %v1716_v14  ;;  %v1767_v14 = vld [vmem:[#allocation5 + $0x304] ss:$16 sps:$4 sm:$0xff]  }
 0x163   :  { %728 = vmatprep.subr.bf16.mxu1 %v1724_v17  ;;  %690 = vmatpush1.bf16.msra.mxu0 %v1731_v23  ;;  %v1768_v17 = vld [vmem:[#allocation5 + $0x320] ss:$16 sps:$4 sm:$0xff]  }
 0x164   :  { %691 = vmatprep.subr.bf16.mxu0 %v1732_v26  ;;  %v1777_v23 = vld [vmem:[#allocation5 + $0x380] ss:$16 sps:$4 sm:$0xff]   ;;  %v1782_v26 = vld [vmem:[#allocation5 + $0x3a4] ss:$16 sps:$4 sm:$0xff]  }
 0x166   :  { %729 = vmatpush1.bf16.msra.mxu1 %v1722_v18  ;;  %v1773_v18 = vld [vmem:[#allocation5 + $0x344] ss:$16 sps:$4 sm:$0xff]  }
 0x167   :  { %730 = vmatprep.subr.bf16.mxu1 %v1730_v21  ;;  %692 = vmatpush1.bf16.msra.mxu0 %v1737_v30  ;;  %v1774_v21 = vld [vmem:[#allocation5 + $0x360] ss:$16 sps:$4 sm:$0xff]  }
 0x168   :  { %693 = vmatprep.subr.bf16.mxu0 %v1738_v31  ;;  %v1783_v30 = vld [vmem:[#allocation5 + $0x3c0] ss:$16 sps:$4 sm:$0xff]   ;;  %v1788_v31 = vld [vmem:[#allocation5 + $0x3e4] ss:$16 sps:$4 sm:$0xff]  }
 0x16a   :  { %731 = vmatpush1.bf16.msra.mxu1 %v1728_v22  ;;  %v1779_v22 = vld [vmem:[#allocation5 + $0x384] ss:$16 sps:$4 sm:$0xff]  }
 0x16b   :  { %732 = vmatprep.subr.bf16.mxu1 %v1736_v27  ;;  %694 = vmatpush1.bf16.msra.mxu0 %v1743_v35  ;;  %v1780_v27 = vld [vmem:[#allocation5 + $0x3a0] ss:$16 sps:$4 sm:$0xff]  }
 0x16c   :  { %1166 = vmatprep.subr.bf16.mxu0 %v1746_v36  ;;  %v1789_v35 = vld [vmem:[#allocation5 + $0x400] ss:$16 sps:$4 sm:$0xff]   ;;  %v1794_v36 = vld [vmem:[#allocation5 + $0x424] ss:$16 sps:$4 sm:$0xff]  }
 0x16e   :  { %733 = vmatpush1.bf16.msra.mxu1 %v1734_v29  ;;  %v1785_v29 = vld [vmem:[#allocation5 + $0x3c4] ss:$16 sps:$4 sm:$0xff]  }
 0x16f   :  { %734 = vmatprep.subr.bf16.mxu1 %v1742_v34  ;;  %v1791_v34 = vld [vmem:[#allocation5 + $0x404] ss:$16 sps:$4 sm:$0xff]  }
 0x172   :  { %735 = vmatpush1.bf16.msra.mxu1 %v1740_v32  ;;  %v1786_v32 = vld [vmem:[#allocation5 + $0x3e0] ss:$16 sps:$4 sm:$0xff]  }
 0x173   :  { %1595 = vmatprep.subr.bf16.mxu1 %v1840_v37 }
 0x208   :  { %v404_v39 = vpop.f32.mrb[8].mxu1 }
 0x209   :  { %v405_v40 = vadd.f32 %v404_v39, %v230_v38  ;;  %v406_v42 = vpop.f32.mrb[9].mxu1  ;;  %v1841_v38 = vld [vmem:[#allocation5 + $0x620] ss:$16 sps:$4 sm:$0xff]  }
 0x20a   :  { %v408_v43 = vpop.f32.mrb[10].mxu1  ;;  %v407_v46 = vadd.f32 %v406_v42, %v234_v41  ;;  %v1842_v39 = vld [vmem:[#allocation5 + $0x740] ss:$16 sps:$4 sm:$0xff]  }
 0x20b   :  { %v451_v44 = vmul.f32 0.5, %v405_v40  ;;  %v409_v45 = vpop.f32.mrb[11].mxu1  ;;  %v1843_v40 = vld [vmem:[#allocation5 + $0x640] ss:$16 sps:$4 sm:$0xff]  }
 0x20c   :  { %v1844_v41 = vld [vmem:[#allocation5 + $0x760] ss:$16 sps:$4 sm:$0xff]  }
 0x20d   :  { %1864 = vtanh.f32 %v451_v44  ;;  %v1845_v42 = vld [vmem:[#allocation5 + $0x660] ss:$16 sps:$4 sm:$0xff]  }
 0x20e   :  { %1866 = vtanh.f32 %v407_v46  ;;  %v1846_v43 = vld [vmem:[#allocation5 + $0x780] ss:$16 sps:$4 sm:$0xff]  }
 0x20f   :  { %v1847_v44 = vld [vmem:[#allocation5 + $0x680] ss:$16 sps:$4 sm:$0xff]  }
 0x210   :  { %v1848_v45 = vld [vmem:[#allocation5 + $0x7a0] ss:$16 sps:$4 sm:$0xff]  }
 0x211   :  { %v1849_v46 = vld [vmem:[#allocation5 + $0x6a0] ss:$16 sps:$4 sm:$0xff]  }
 0x217   :  { %v1865_v47 = vpop.eup %1864 }
 0x218   :  { %v453_v48 = vmul.f32 0.5, %v1865_v47  ;;  %v1867_v50 = vpop.eup %1866  ;;  %v1850_v47 = vld [vmem:[#allocation5 + $0x7c0] ss:$16 sps:$4 sm:$0xff]  }
 0x21a   :  { %v454_v49 = vadd.f32 0.5, %v453_v48  ;;  %v1851_v48 = vld [vmem:[#allocation5 + $0x6c0] ss:$16 sps:$4 sm:$0xff]  }
 0x21c   :  { %v460_v51 = vmul.f32 %v1867_v50, %v454_v49  ;;  %v2069_v49 = vld [vmem:[#allocation7 + $0x40] ss:$8 sm:$0xf]  ;;  %v513_v50 = vsub.s32 3, %v2042_v24 }
 0x21d   :  { %v510_v37 = vrot.slane %v2069_v49, %v2053_v33  ;;  %v1854_v33 = vld [vmem:[#allocation5 + $0x800] ss:$16 sps:$4 sm:$0xff]  }
 0x228   :  { %v445_v53 = vpop.f32.mrb[12].mxu1 }
 0x229   :  { %v446_v54 = vadd.f32 %v445_v53, %v238_v52  ;;  %v1641_v55 = vpop.f32.mrb[13].mxu1  ;;  %v506_v52 = vrot.slane %v2069_v49, %v2049_v28  ;;  %v514_v53 = vrot.slane %v2069_v49, %v513_v50 }
 0x22a   :  { %v448_v56 = vpop.f32.mrb[14].mxu1 }
 0x22b   :  { %v456_v57 = vmul.f32 0.5, %v446_v54  ;;  %v1642_v58 = vpop.f32.mrb[15].mxu1 }
 0x22d   :  { %1868 = vtanh.f32 %v456_v57 }
 0x22e   :  { %1870 = vtanh.f32 %v460_v51  ;;  %v502_v51 = vrot.slane %v2069_v49, %v2045_v25 }
 0x237   :  { %v1869_v59 = vpop.eup %1868 }
 0x238   :  { %v458_v60 = vmul.f32 0.5, %v1869_v59  ;;  %v1871_v62 = vpop.eup %1870 }
 0x23a   :  { %v459_v61 = vadd.f32 0.5, %v458_v60 }
 0x23c   :  { %v462_v63 = vmul.f32 %v1871_v62, %v459_v61 }
 0x23e   :  { %v497_v2 = vpack.c.bf16 %v462_v63, %v462_v63 }
 0x240   :  { %712 = vmatmul.mubr.bf16.vlgmr.msra.gmra.mrb[0].mxu0 %v497_v2  ;;  %753 = vmatmul.mubr.bf16.vlgmr.msra.gmra.mrb[16].mxu1 %v497_v2 }
 0x241   :  { %1167 = vmatpush1.bf16.msra.mxu0 %v1744_v1  ;;  %1596 = vmatpush3.bf16.msra.mxu1 %v1841_v38  ;;  %v1836_v38 = vld [vmem:[#allocation5 + $0x5e4] ss:$16 sps:$4 sm:$0xff]  }
 0x242   :  { %1168 = vmatprep.subr.bf16.mxu0 %v1749_v3  ;;  %1597 = vmatprep.subr.bf16.mxu1 %v1842_v39  ;;  %v1834_v39 = vld [vmem:[#allocation5 + $0x5e0] ss:$16 sps:$4 sm:$0xff]  }
 0x245   :  { %1169 = vmatpush1.bf16.msra.mxu0 %v1747_v4  ;;  %1598 = vmatpush3.bf16.msra.mxu1 %v1843_v40 }
 0x246   :  { %1170 = vmatprep.subr.bf16.mxu0 %v1752_v5  ;;  %1599 = vmatprep.subr.bf16.mxu1 %v1844_v41  ;;  %v1792_v5 = vld [vmem:[#allocation5 + $0x420] ss:$16 sps:$4 sm:$0xff]   ;;  %v1839_v41 = vld [vmem:[#allocation5 + $0x604] ss:$16 sps:$4 sm:$0xff]  }
 0x249   :  { %1171 = vmatpush1.bf16.msra.mxu0 %v1750_v7  ;;  %1600 = vmatpush3.bf16.msra.mxu1 %v1845_v42  ;;  %v1837_v42 = vld [vmem:[#allocation5 + $0x600] ss:$16 sps:$4 sm:$0xff]  }
 0x24a   :  { %1172 = vmatprep.subr.bf16.mxu0 %v1755_v8  ;;  %1601 = vmatprep.subr.bf16.mxu1 %v1846_v43  ;;  %v1797_v8 = vld [vmem:[#allocation5 + $0x444] ss:$16 sps:$4 sm:$0xff]  }
 0x24d   :  { %1173 = vmatpush1.bf16.msra.mxu0 %v1753_v9  ;;  %1602 = vmatpush3.bf16.msra.mxu1 %v1847_v44 }
 0x24e   :  { %1174 = vmatprep.subr.bf16.mxu0 %v1758_v6  ;;  %1603 = vmatprep.subr.bf16.mxu1 %v1848_v45  ;;  %v1795_v6 = vld [vmem:[#allocation5 + $0x440] ss:$16 sps:$4 sm:$0xff]  }
 0x24f   :  { %v1852_v45 = vld [vmem:[#allocation5 + $0x7e0] ss:$16 sps:$4 sm:$0xff]  }
 0x251   :  { %1175 = vmatpush1.bf16.msra.mxu0 %v1756_v10  ;;  %1604 = vmatpush3.bf16.msra.mxu1 %v1849_v46  ;;  %v1800_v10 = vld [vmem:[#allocation5 + $0x464] ss:$16 sps:$4 sm:$0xff]   ;;  %v1853_v46 = vld [vmem:[#allocation5 + $0x6e0] ss:$16 sps:$4 sm:$0xff]  }
 0x252   :  { %1176 = vmatprep.subr.bf16.mxu0 %v1761_v11  ;;  %1605 = vmatprep.subr.bf16.mxu1 %v1850_v47  ;;  %v1798_v11 = vld [vmem:[#allocation5 + $0x460] ss:$16 sps:$4 sm:$0xff]  }
 0x253   :  { %v1855_v47 = vld [vmem:[#allocation5 + $0x700] ss:$16 sps:$4 sm:$0xff]  }
 0x255   :  { %1177 = vmatpush1.bf16.msra.mxu0 %v1759_v0  ;;  %1606 = vmatpush3.bf16.msra.mxu1 %v1851_v48  ;;  %v1803_v0 = vld [vmem:[#allocation5 + $0x484] ss:$16 sps:$4 sm:$0xff]   ;;  %v830_v48 = vld [vmem:[#allocation7 + $0x60] ss:$8 sm:$0x3] }
 0x256   :  { %1178 = vmatprep.subr.bf16.mxu0 %v1764_v12  ;;  %v1801_v12 = vld [vmem:[#allocation5 + $0x480] ss:$16 sps:$4 sm:$0xff]   ;;  %1607 = vmatprep.subr.bf16.mxu1 %v1852_v45  ;;  %v839_v49 = vrot.slane %v830_v48, %v2045_v25  ;;  %v843_v50 = vrot.slane %v830_v48, %v2049_v28 }
 0x259   :  { %1179 = vmatpush1.bf16.msra.mxu0 %v1762_v13  ;;  %v1806_v13 = vld [vmem:[#allocation5 + $0x4a4] ss:$16 sps:$4 sm:$0xff]   ;;  %1608 = vmatpush3.bf16.msra.mxu1 %v1853_v46 }
 0x25a   :  { %1180 = vmatprep.subr.bf16.mxu0 %v1767_v14  ;;  %v1804_v14 = vld [vmem:[#allocation5 + $0x4a0] ss:$16 sps:$4 sm:$0xff]   ;;  %1609 = vmatprep.subr.bf16.mxu1 %v1854_v33 }
 0x25d   :  { %1181 = vmatpush1.bf16.msra.mxu0 %v1765_v15  ;;  %v1809_v15 = vld [vmem:[#allocation5 + $0x4c4] ss:$16 sps:$4 sm:$0xff]   ;;  %1610 = vmatpush3.bf16.msra.mxu1 %v1855_v47 }
 0x25e   :  { %1182 = vmatprep.subr.bf16.mxu0 %v1770_v16  ;;  %v1807_v16 = vld [vmem:[#allocation5 + $0x4c0] ss:$16 sps:$4 sm:$0xff]  }
 0x261   :  { %1183 = vmatpush1.bf16.msra.mxu0 %v1768_v17  ;;  %v1812_v17 = vld [vmem:[#allocation5 + $0x4e4] ss:$16 sps:$4 sm:$0xff]  }
 0x262   :  { %1184 = vmatprep.subr.bf16.mxu0 %v1773_v18  ;;  %v1810_v18 = vld [vmem:[#allocation5 + $0x4e0] ss:$16 sps:$4 sm:$0xff]  }
 0x265   :  { %1185 = vmatpush1.bf16.msra.mxu0 %v1771_v19  ;;  %v1815_v19 = vld [vmem:[#allocation5 + $0x504] ss:$16 sps:$4 sm:$0xff]  }
 0x266   :  { %1186 = vmatprep.subr.bf16.mxu0 %v1776_v20  ;;  %v1813_v20 = vld [vmem:[#allocation5 + $0x500] ss:$16 sps:$4 sm:$0xff]  }
 0x269   :  { %1187 = vmatpush1.bf16.msra.mxu0 %v1774_v21  ;;  %v1818_v21 = vld [vmem:[#allocation5 + $0x524] ss:$16 sps:$4 sm:$0xff]  }
 0x26a   :  { %1188 = vmatprep.subr.bf16.mxu0 %v1779_v22  ;;  %v1816_v22 = vld [vmem:[#allocation5 + $0x520] ss:$16 sps:$4 sm:$0xff]  }
 0x26d   :  { %1189 = vmatpush1.bf16.msra.mxu0 %v1777_v23  ;;  %v1821_v23 = vld [vmem:[#allocation5 + $0x544] ss:$16 sps:$4 sm:$0xff]  }
 0x26e   :  { %1190 = vmatprep.subr.bf16.mxu0 %v1782_v26  ;;  %v1819_v26 = vld [vmem:[#allocation5 + $0x540] ss:$16 sps:$4 sm:$0xff]  }
 0x271   :  { %1191 = vmatpush1.bf16.msra.mxu0 %v1780_v27  ;;  %v1824_v27 = vld [vmem:[#allocation5 + $0x564] ss:$16 sps:$4 sm:$0xff]  }
 0x272   :  { %1192 = vmatprep.subr.bf16.mxu0 %v1785_v29  ;;  %v1822_v29 = vld [vmem:[#allocation5 + $0x560] ss:$16 sps:$4 sm:$0xff]  }
 0x275   :  { %1193 = vmatpush1.bf16.msra.mxu0 %v1783_v30  ;;  %v1827_v30 = vld [vmem:[#allocation5 + $0x584] ss:$16 sps:$4 sm:$0xff]  }
 0x276   :  { %1194 = vmatprep.subr.bf16.mxu0 %v1788_v31  ;;  %v1825_v31 = vld [vmem:[#allocation5 + $0x580] ss:$16 sps:$4 sm:$0xff]  }
 0x279   :  { %1195 = vmatpush1.bf16.msra.mxu0 %v1786_v32  ;;  %v1830_v32 = vld [vmem:[#allocation5 + $0x5a4] ss:$16 sps:$4 sm:$0xff]  }
 0x27a   :  { %1196 = vmatprep.subr.bf16.mxu0 %v1791_v34  ;;  %v1828_v34 = vld [vmem:[#allocation5 + $0x5a0] ss:$16 sps:$4 sm:$0xff]  }
 0x27d   :  { %1197 = vmatpush1.bf16.msra.mxu0 %v1789_v35  ;;  %v1833_v35 = vld [vmem:[#allocation5 + $0x5c4] ss:$16 sps:$4 sm:$0xff]  }
 0x27e   :  { %1207 = vmatprep.subr.bf16.mxu0 %v1794_v36  ;;  %v1831_v36 = vld [vmem:[#allocation5 + $0x5c0] ss:$16 sps:$4 sm:$0xff]  }
 0x313   :  { %v713_v54 = vpop.f32.mrb[0].mxu0  ;;  %v2077_v55 = vpop.f32.mrb[16].mxu1 }
 0x314   :  { %v714_v56 = vadd.f32 %v713_v54, %v502_v51  ;;  %v715_v57 = vpop.f32.mrb[1].mxu0  ;;  %v756_v58 = vpop.f32.mrb[17].mxu1  ;;  %v755_v40 = vadd.f32 %v2077_v55, %v510_v37 }
 0x315   :  { %v716_v59 = vadd.f32 %v715_v57, %v506_v52  ;;  %v757_v60 = vadd.f32 %v756_v58, %v514_v53  ;;  %v717_v61 = vpop.f32.mrb[2].mxu0  ;;  %v758_v62 = vpop.f32.mrb[18].mxu1 }
 0x316   :  { %v761_v63 = vmax.f32 %v714_v56, 0.0  ;;  %v718_v24 = vpop.f32.mrb[3].mxu0  ;;  %v759_v1 = vpop.f32.mrb[19].mxu1  ;;  %v763_v43 = vmax.f32 %v755_v40, 0.0  ;;  %v1282_v62 = vld [vmem:[#allocation7 + $0x80] ss:$0 sm:$0xff] }
 0x317   :  { %v762_v2 = vmax.f32 %v716_v59, 0.0  ;;  %v764_v3 = vmax.f32 %v757_v60, 0.0 }
 0x318   :  { %v831_v7 = vpack.c.bf16 %v761_v63, %v761_v63  ;;  %v833_v44 = vpack.c.bf16 %v763_v43, %v763_v43 }
 0x319   :  { %v832_v4 = vpack.c.bf16 %v762_v2, %v762_v2  ;;  %v834_v9 = vpack.c.bf16 %v764_v3, %v764_v3 }
 0x31b   :  { %1198 = vmatprep.mubr.bf16.mxu0 %v832_v4 }
 0x31c   :  { %1199 = vmatmul.mubr.bf16.vlgmr.msra.gmra.mrb[4].mxu0 %v831_v7 }
 0x31d   :  { %1208 = vmatpush1.bf16.msra.mxu0 %v1792_v5  ;;  %1239 = vmatprep.mubr.bf16.mxu0 %v834_v9 }
 0x31e   :  { %1209 = vmatprep.subr.bf16.mxu0 %v1797_v8 }
 0x321   :  { %1210 = vmatpush1.bf16.msra.mxu0 %v1795_v6 }
 0x322   :  { %1211 = vmatprep.subr.bf16.mxu0 %v1800_v10 }
 0x325   :  { %1212 = vmatpush1.bf16.msra.mxu0 %v1798_v11 }
 0x326   :  { %1213 = vmatprep.subr.bf16.mxu0 %v1803_v0 }
 0x329   :  { %1214 = vmatpush1.bf16.msra.mxu0 %v1801_v12 }
 0x32a   :  { %1215 = vmatprep.subr.bf16.mxu0 %v1806_v13 }
 0x32d   :  { %1216 = vmatpush1.bf16.msra.mxu0 %v1804_v14 }
 0x32e   :  { %1217 = vmatprep.subr.bf16.mxu0 %v1809_v15 }
 0x331   :  { %1218 = vmatpush1.bf16.msra.mxu0 %v1807_v16 }
 0x332   :  { %1219 = vmatprep.subr.bf16.mxu0 %v1812_v17 }
 0x335   :  { %1220 = vmatpush1.bf16.msra.mxu0 %v1810_v18 }
 0x336   :  { %1221 = vmatprep.subr.bf16.mxu0 %v1815_v19 }
 0x339   :  { %1222 = vmatpush1.bf16.msra.mxu0 %v1813_v20 }
 0x33a   :  { %1223 = vmatprep.subr.bf16.mxu0 %v1818_v21 }
 0x33d   :  { %1224 = vmatpush1.bf16.msra.mxu0 %v1816_v22 }
 0x33e   :  { %1225 = vmatprep.subr.bf16.mxu0 %v1821_v23 }
 0x341   :  { %1226 = vmatpush1.bf16.msra.mxu0 %v1819_v26 }
 0x342   :  { %1227 = vmatprep.subr.bf16.mxu0 %v1824_v27 }
 0x345   :  { %1228 = vmatpush1.bf16.msra.mxu0 %v1822_v29 }
 0x346   :  { %1229 = vmatprep.subr.bf16.mxu0 %v1827_v30 }
 0x349   :  { %1230 = vmatpush1.bf16.msra.mxu0 %v1825_v31 }
 0x34a   :  { %1231 = vmatprep.subr.bf16.mxu0 %v1830_v32 }
 0x34d   :  { %1232 = vmatpush1.bf16.msra.mxu0 %v1828_v34 }
 0x34e   :  { %1233 = vmatprep.subr.bf16.mxu0 %v1833_v35 }
 0x351   :  { %1234 = vmatpush1.bf16.msra.mxu0 %v1831_v36 }
 0x352   :  { %1235 = vmatprep.subr.bf16.mxu0 %v1836_v38 }
 0x355   :  { %1236 = vmatpush1.bf16.msra.mxu0 %v1834_v39 }
 0x356   :  { %1237 = vmatprep.subr.bf16.mxu0 %v1839_v41 }
 0x359   :  { %1238 = vmatpush1.bf16.msra.mxu0 %v1837_v42 }
 0x35c   :  { %1240 = vmatmul.mubr.bf16.vlgmr.msra.gmra.mrb[4].mxu0 %v833_v44 }
 0x42f   :  { %v1241_v51 = vpop.f32.mrb[4].mxu0 }
 0x430   :  { %v1643_v52 = vadd.f32 %v1241_v51, %v839_v49  ;;  %v1243_v53 = vpop.f32.mrb[5].mxu0 }
 0x431   :  { %v1644_v54 = vadd.f32 %v1243_v53, %v843_v50  ;;  %v1245_v55 = vpop.f32.mrb[6].mxu0 }
 0x432   :  { %v1248_v56 = vmax.f32 %v1643_v52, 0.0  ;;  %v1246_v57 = vpop.f32.mrb[7].mxu0 }
 0x433   :  { %v1249_v58 = vmax.f32 %v1644_v54, 0.0 }
 0x434   :  { %v1283_v60 = vpack.c.bf16 %v1248_v56, %v1248_v56 }
 0x435   :  { %v1284_v59 = vpack.c.bf16 %v1249_v58, %v1249_v58 }
 0x437   :  { %1413 = vmatprep.mubr.bf16.mxu1 %v1284_v59 }
 0x438   :  { %1414 = vmatmul.mubr.bf16.vlgmr.msra.gmra.mrb[20].mxu1 %v1283_v60 }
 0x50b   :  { %v1611_v61 = vpop.f32.mrb[20].mxu1 }
 0x50c   :  { %v1612_v63 = vpop.f32.mrb[21].mxu1 }
 0x50d   :  { %v1613_v24 = vadd.f32 %v1612_v63, %v1611_v61  ;;  %v1614_v1 = vpop.f32.mrb[22].mxu1 }
 0x50e   :  { %v1615_v25 = vpop.f32.mrb[23].mxu1 }
 0x50f   :  { %v1416_v2 = vadd.f32 %v1613_v24, %v1282_v62 }
 0x511   :  { %v1421_v28 = vmul.f32 0.5, %v1416_v2 }
 0x513   :  { %1872 = vtanh.f32 %v1421_v28 }
 0x51d   :  { %v1873_v3 = vpop.eup %1872 }
 0x51e   :  { %v1423_v4 = vmul.f32 0.5, %v1873_v3 }
 0x520   :  { %v1424_v5 = vadd.f32 0.5, %v1423_v4 }
 0x522   :  { %v1425_v7 = vpack.c.bf16 %v1424_v5, %v1424_v5 }
 0x524   :  { %1426 = vst [vmem:[#allocation8] sm:$0xf] %v1425_v7 }
 0x525   :  { %1951 = shalt.err (!%p1948_p0)
}
 0x526   :  { %s1952_s27 = scalar_lea.hbm %s2099_s3, 64 }
 0x527   :  { %p1953_p1 = scmp.ne.s32.totalorder %s2099_s3, %s1952_s27  ;;  %p1956_p2 = scmp.lt.u32.totalorder %s1952_s27, %s2099_s3 }
 0x529   :  { %p1958_p3 = pnand %p1956_p2, %p1953_p1 }
 0x52b   :  { %1961 = shalt.err (!%p1958_p3)
}
 0x52c   :  { %1436 = dma.vmem_to_hbm [thread:$0]  %s1434_s23, 64, %s2099_s3, [#allocation4]  }
 0x52d   :  { %1966 = dma.done.wait [#allocation4], 64  }
 0x52e   :  { %1967 = vsyncadd [#allocation4], 4294967232 }
 0x52f   :  { %1440 = vsyncpa [#allocation3], 1 }
 0x530   :  { %1441 = vsyncpa [#allocation6], 1 }
 0x531   :  { %1442 = vsyncpa [#allocation4], 1 }

</bundles_post_ra>
